<compile_context>
chip_gen: v7x
topology: tpu7x:2x2x1
jax: 0.10.0
libtpu: 0.0.40
codegen_flags: <defaults>
</compile_context>

<pallas_src>
import functools

import jax
import jax.numpy as jnp
from jax.experimental import pallas as pl
from jax.experimental.pallas import tpu as pltpu


def _model_kernel(ids_ref, emb_ref, params_ref, out_ref, *, sent_len, vocab):
    """Fused embedding+mean-pool, hoisted input projection, unrolled 2-layer tanh RNN
    over the batch axis (VPU mat-vecs), single batched sigmoid + one output store."""
    ids = ids_ref[...]                                    # (B, S) int32
    B = ids.shape[0]
    D = emb_ref.shape[1]
    H = out_ref.shape[1]

    # --- unpack the packed parameter slab (static row offsets) ---------------
    params = params_ref[...]                              # (D + 3H + 2, H) f32
    w_ih0 = params[0:D, :]                                # (D, H)  pre-transposed
    w_hh0 = params[D:D + H, :]                            # (H, H)  pre-transposed
    w_ih1 = params[D + H:D + 2 * H, :]                    # (H, H)  pre-transposed
    w_hh1 = params[D + 2 * H:D + 3 * H, :]                # (H, H)  pre-transposed
    b0 = params[D + 3 * H:D + 3 * H + 1, :]               # (1, H) = b_ih_l0 + b_hh_l0
    b1 = params[D + 3 * H + 1:D + 3 * H + 2, :]           # (1, H) = b_ih_l1 + b_hh_l1

    # --- embedding + AvgPool1d over the sentence axis, fused -----------------
    # mean_s emb[ids[b, s]]  ==  (token-count-vector[b] / S) @ emb_table
    iota_v = jax.lax.broadcasted_iota(jnp.int32, (B, vocab), 1)   # (B, V)
    counts = jnp.zeros((B, vocab), jnp.float32)
    for s in range(sent_len):                             # static, tiny S; off the critical path
        counts = counts + (ids[:, s:s + 1] == iota_v).astype(jnp.float32)
    pooled = jnp.dot(counts, emb_ref[...],
                     preferred_element_type=jnp.float32) * (1.0 / sent_len)   # (B, D)

    # --- hoisted layer-1 input projection: one (B,D)@(D,H) matmul + bias -----
    xw0 = jnp.dot(pooled, w_ih0, preferred_element_type=jnp.float32) + b0     # (B, H)

    # (1,H) @ (H,H) on the VPU as H broadcast-multiply-adds; at H=3 an MXU matmul
    # per serial step is >99% wasted and its push->pop latency dominates.
    # Row slices of the recurrence weights are hoisted so they are traced once,
    # not once per unrolled step.
    w_hh0_rows = [w_hh0[j:j + 1, :] for j in range(H)]
    w_ih1_rows = [w_ih1[j:j + 1, :] for j in range(H)]
    w_hh1_rows = [w_hh1[j:j + 1, :] for j in range(H)]

    def vec_mat(v, rows):
        acc = v[:, 0:1] * rows[0]
        for j in range(1, H):
            acc = acc + v[:, j:j + 1] * rows[j]
        return acc

    # --- 2-layer vanilla RNN (tanh), recurring over the batch axis -----------
    # Fully unrolled (B static & tiny); hidden state carried in vregs — no VMEM
    # scratch reads/writes inside the recurrence.
    h1 = jnp.zeros((1, H), jnp.float32)
    h2 = jnp.zeros((1, H), jnp.float32)
    rows = []
    for t in range(B):
        h1 = jnp.tanh(xw0[t:t + 1, :] + vec_mat(h1, w_hh0_rows))
        h2 = jnp.tanh(vec_mat(h1, w_ih1_rows) + vec_mat(h2, w_hh1_rows) + b1)
        rows.append(h2)

    # One batched sigmoid (EUP) on the stacked rows + a single output store.
    out_ref[...] = jax.nn.sigmoid(jnp.concatenate(rows, axis=0))
    # TODO(synk): training-time cross_entropy branch (y is not None) is not
    # implemented in-kernel; only the inference path (y_pred) is produced.


def torch_model_forward(ids, emb, w_ih0, w_hh0, b_ih0, b_hh0,
                        w_ih1, w_hh1, b_ih1, b_hh1):
    """ids: (B, S) int32 token ids. Returns y_pred of shape (B, 3)."""
    B, S = ids.shape
    V, D = emb.shape
    H = w_ih0.shape[0]   # 3

    f32 = jnp.float32
    # Glue: pre-transpose weights so kernel matmuls / mat-vecs are plain (row @ W),
    # and pack every RNN parameter into ONE slab -> fewer kernel inputs / DMAs.
    params = jnp.concatenate([
        jnp.asarray(w_ih0, f32).T,                                     # (D, H)
        jnp.asarray(w_hh0, f32).T,                                     # (H, H)
        jnp.asarray(w_ih1, f32).T,                                     # (H, H)
        jnp.asarray(w_hh1, f32).T,                                     # (H, H)
        (jnp.asarray(b_ih0, f32) + jnp.asarray(b_hh0, f32)).reshape(1, H),
        (jnp.asarray(b_ih1, f32) + jnp.asarray(b_hh1, f32)).reshape(1, H),
    ], axis=0)                                                         # (D + 3H + 2, H)

    # TODO(synk): at realistic vocab sizes (esp. v7x's 64 MiB VMEM) switch emb to
    # memory_space=pl.ANY with a DMA row-gather instead of table-resident one-hot.
    vmem_spec = pl.BlockSpec(memory_space=pltpu.MemorySpace.VMEM)
    return pl.pallas_call(
        functools.partial(_model_kernel, sent_len=S, vocab=V),
        out_shape=jax.ShapeDtypeStruct((B, H), jnp.float32),
        in_specs=[vmem_spec, vmem_spec, vmem_spec],
        out_specs=vmem_spec,
    )(ids.astype(jnp.int32), jnp.asarray(emb, f32), params)


if __name__ == "__main__":
    # Small shapes consistent with the module:
    #   vocab size V=30, vector_dim D=32, sentence_length S=8, batch B=4, hidden=3.
    B, S, V, D, H = 4, 8, 30, 32, 3

    key = jax.random.PRNGKey(0)
    k_ids, k_emb, k0, k1, k2, k3, k4, k5, k6, k7 = jax.random.split(key, 10)

    ids = jax.random.randint(k_ids, (B, S), 0, V, dtype=jnp.int32)

    # Deterministic synthetic parameters (shapes match nn.Embedding / nn.RNN init).
    emb = jax.random.normal(k_emb, (V, D), jnp.float32)
    bound = 1.0 / jnp.sqrt(jnp.float32(H))
    uni = lambda k, shape: jax.random.uniform(k, shape, jnp.float32, -bound, bound)
    w_ih0 = uni(k0, (H, D))
    w_hh0 = uni(k1, (H, H))
    b_ih0 = uni(k2, (H,))
    b_hh0 = uni(k3, (H,))
    w_ih1 = uni(k4, (H, H))
    w_hh1 = uni(k5, (H, H))
    b_ih1 = uni(k6, (H,))
    b_hh1 = uni(k7, (H,))

    y_pred = torch_model_forward(ids, emb, w_ih0, w_hh0, b_ih0, b_hh0,
                                 w_ih1, w_hh1, b_ih1, b_hh1)
    y_pred = jax.block_until_ready(y_pred)
    assert y_pred.shape == (B, H)
    print("KERNEL_OK")
</pallas_src>

<mosaic_0001>
module attributes {stable_mosaic.version = 11 : i64} {
  func.func @_model_kernel(%arg0: memref<4x8xi32, #tpu.memory_space<vmem>>, %arg1: memref<30x32xf32, #tpu.memory_space<vmem>>, %arg2: memref<43x3xf32, #tpu.memory_space<vmem>>, %arg3: memref<4x3xf32, #tpu.memory_space<vmem>>) attributes {dimension_semantics = [], scalar_prefetch = 0 : i64, scratch_operands = 0 : i64, tpu.core_type = #tpu.core_type<tc>} {
    %c0 = arith.constant 0 : index
    %c0_0 = arith.constant 0 : index
    %0 = vector.load %arg0[%c0, %c0_0] : memref<4x8xi32, #tpu.memory_space<vmem>>, vector<4x8xi32>
    %c0_1 = arith.constant 0 : index
    %c0_2 = arith.constant 0 : index
    %1 = vector.load %arg2[%c0_1, %c0_2] : memref<43x3xf32, #tpu.memory_space<vmem>>, vector<43x3xf32>
    %2 = vector.extract_strided_slice %1 {offsets = [0, 0], sizes = [32, 3], strides = [1, 1]} : vector<43x3xf32> to vector<32x3xf32>
    %3 = vector.extract_strided_slice %1 {offsets = [32, 0], sizes = [3, 3], strides = [1, 1]} : vector<43x3xf32> to vector<3x3xf32>
    %4 = vector.extract_strided_slice %1 {offsets = [35, 0], sizes = [3, 3], strides = [1, 1]} : vector<43x3xf32> to vector<3x3xf32>
    %5 = vector.extract_strided_slice %1 {offsets = [38, 0], sizes = [3, 3], strides = [1, 1]} : vector<43x3xf32> to vector<3x3xf32>
    %6 = vector.extract_strided_slice %1 {offsets = [41, 0], sizes = [1, 3], strides = [1, 1]} : vector<43x3xf32> to vector<1x3xf32>
    %7 = vector.extract_strided_slice %1 {offsets = [42, 0], sizes = [1, 3], strides = [1, 1]} : vector<43x3xf32> to vector<1x3xf32>
    %8 = tpu.iota {dimensions = array<i32: 1>} : vector<4x30xi32>
    %cst = arith.constant 0.000000e+00 : f32
    %9 = vector.broadcast %cst : f32 to vector<4x30xf32>
    %10 = vector.extract_strided_slice %0 {offsets = [0, 0], sizes = [4, 1], strides = [1, 1]} : vector<4x8xi32> to vector<4x1xi32>
    %11 = vector.broadcast %10 : vector<4x1xi32> to vector<4x30xi32>
    %12 = arith.cmpi eq, %11, %8 : vector<4x30xi32>
    %13 = arith.extui %12 : vector<4x30xi1> to vector<4x30xi32>
    %14 = arith.sitofp %13 : vector<4x30xi32> to vector<4x30xf32>
    %15 = arith.addf %9, %14 : vector<4x30xf32>
    %16 = vector.extract_strided_slice %0 {offsets = [0, 1], sizes = [4, 1], strides = [1, 1]} : vector<4x8xi32> to vector<4x1xi32>
    %17 = vector.broadcast %16 : vector<4x1xi32> to vector<4x30xi32>
    %18 = arith.cmpi eq, %17, %8 : vector<4x30xi32>
    %19 = arith.extui %18 : vector<4x30xi1> to vector<4x30xi32>
    %20 = arith.sitofp %19 : vector<4x30xi32> to vector<4x30xf32>
    %21 = arith.addf %15, %20 : vector<4x30xf32>
    %22 = vector.extract_strided_slice %0 {offsets = [0, 2], sizes = [4, 1], strides = [1, 1]} : vector<4x8xi32> to vector<4x1xi32>
    %23 = vector.broadcast %22 : vector<4x1xi32> to vector<4x30xi32>
    %24 = arith.cmpi eq, %23, %8 : vector<4x30xi32>
    %25 = arith.extui %24 : vector<4x30xi1> to vector<4x30xi32>
    %26 = arith.sitofp %25 : vector<4x30xi32> to vector<4x30xf32>
    %27 = arith.addf %21, %26 : vector<4x30xf32>
    %28 = vector.extract_strided_slice %0 {offsets = [0, 3], sizes = [4, 1], strides = [1, 1]} : vector<4x8xi32> to vector<4x1xi32>
    %29 = vector.broadcast %28 : vector<4x1xi32> to vector<4x30xi32>
    %30 = arith.cmpi eq, %29, %8 : vector<4x30xi32>
    %31 = arith.extui %30 : vector<4x30xi1> to vector<4x30xi32>
    %32 = arith.sitofp %31 : vector<4x30xi32> to vector<4x30xf32>
    %33 = arith.addf %27, %32 : vector<4x30xf32>
    %34 = vector.extract_strided_slice %0 {offsets = [0, 4], sizes = [4, 1], strides = [1, 1]} : vector<4x8xi32> to vector<4x1xi32>
    %35 = vector.broadcast %34 : vector<4x1xi32> to vector<4x30xi32>
    %36 = arith.cmpi eq, %35, %8 : vector<4x30xi32>
    %37 = arith.extui %36 : vector<4x30xi1> to vector<4x30xi32>
    %38 = arith.sitofp %37 : vector<4x30xi32> to vector<4x30xf32>
    %39 = arith.addf %33, %38 : vector<4x30xf32>
    %40 = vector.extract_strided_slice %0 {offsets = [0, 5], sizes = [4, 1], strides = [1, 1]} : vector<4x8xi32> to vector<4x1xi32>
    %41 = vector.broadcast %40 : vector<4x1xi32> to vector<4x30xi32>
    %42 = arith.cmpi eq, %41, %8 : vector<4x30xi32>
    %43 = arith.extui %42 : vector<4x30xi1> to vector<4x30xi32>
    %44 = arith.sitofp %43 : vector<4x30xi32> to vector<4x30xf32>
    %45 = arith.addf %39, %44 : vector<4x30xf32>
    %46 = vector.extract_strided_slice %0 {offsets = [0, 6], sizes = [4, 1], strides = [1, 1]} : vector<4x8xi32> to vector<4x1xi32>
    %47 = vector.broadcast %46 : vector<4x1xi32> to vector<4x30xi32>
    %48 = arith.cmpi eq, %47, %8 : vector<4x30xi32>
    %49 = arith.extui %48 : vector<4x30xi1> to vector<4x30xi32>
    %50 = arith.sitofp %49 : vector<4x30xi32> to vector<4x30xf32>
    %51 = arith.addf %45, %50 : vector<4x30xf32>
    %52 = vector.extract_strided_slice %0 {offsets = [0, 7], sizes = [4, 1], strides = [1, 1]} : vector<4x8xi32> to vector<4x1xi32>
    %53 = vector.broadcast %52 : vector<4x1xi32> to vector<4x30xi32>
    %54 = arith.cmpi eq, %53, %8 : vector<4x30xi32>
    %55 = arith.extui %54 : vector<4x30xi1> to vector<4x30xi32>
    %56 = arith.sitofp %55 : vector<4x30xi32> to vector<4x30xf32>
    %57 = arith.addf %51, %56 : vector<4x30xf32>
    %c0_3 = arith.constant 0 : index
    %c0_4 = arith.constant 0 : index
    %58 = vector.load %arg1[%c0_3, %c0_4] : memref<30x32xf32, #tpu.memory_space<vmem>>, vector<30x32xf32>
    %cst_5 = arith.constant dense<0.000000e+00> : vector<4x32xf32>
    %59 = tpu.matmul %57, %58, %cst_5 {dimension_numbers = #tpu.dot_dimension_numbers<[1], [0], [0], [1], [0, 0, 1, 1], [], []>} : vector<4x30xf32>, vector<30x32xf32>, vector<4x32xf32> -> vector<4x32xf32>
    %cst_6 = arith.constant 1.250000e-01 : f32
    %60 = vector.broadcast %cst_6 : f32 to vector<4x32xf32>
    %61 = arith.mulf %59, %60 : vector<4x32xf32>
    %cst_7 = arith.constant dense<0.000000e+00> : vector<4x3xf32>
    %62 = tpu.matmul %61, %2, %cst_7 {dimension_numbers = #tpu.dot_dimension_numbers<[1], [0], [0], [1], [0, 0, 1, 1], [], []>} : vector<4x32xf32>, vector<32x3xf32>, vector<4x3xf32> -> vector<4x3xf32>
    %63 = vector.broadcast %6 : vector<1x3xf32> to vector<4x3xf32>
    %64 = arith.addf %62, %63 : vector<4x3xf32>
    %65 = vector.extract_strided_slice %3 {offsets = [0, 0], sizes = [1, 3], strides = [1, 1]} : vector<3x3xf32> to vector<1x3xf32>
    %66 = vector.extract_strided_slice %3 {offsets = [1, 0], sizes = [1, 3], strides = [1, 1]} : vector<3x3xf32> to vector<1x3xf32>
    %67 = vector.extract_strided_slice %3 {offsets = [2, 0], sizes = [1, 3], strides = [1, 1]} : vector<3x3xf32> to vector<1x3xf32>
    %68 = vector.extract_strided_slice %4 {offsets = [0, 0], sizes = [1, 3], strides = [1, 1]} : vector<3x3xf32> to vector<1x3xf32>
    %69 = vector.extract_strided_slice %4 {offsets = [1, 0], sizes = [1, 3], strides = [1, 1]} : vector<3x3xf32> to vector<1x3xf32>
    %70 = vector.extract_strided_slice %4 {offsets = [2, 0], sizes = [1, 3], strides = [1, 1]} : vector<3x3xf32> to vector<1x3xf32>
    %71 = vector.extract_strided_slice %5 {offsets = [0, 0], sizes = [1, 3], strides = [1, 1]} : vector<3x3xf32> to vector<1x3xf32>
    %72 = vector.extract_strided_slice %5 {offsets = [1, 0], sizes = [1, 3], strides = [1, 1]} : vector<3x3xf32> to vector<1x3xf32>
    %73 = vector.extract_strided_slice %5 {offsets = [2, 0], sizes = [1, 3], strides = [1, 1]} : vector<3x3xf32> to vector<1x3xf32>
    %cst_8 = arith.constant 0.000000e+00 : f32
    %74 = vector.broadcast %cst_8 : f32 to vector<1x3xf32>
    %cst_9 = arith.constant 0.000000e+00 : f32
    %75 = vector.broadcast %cst_9 : f32 to vector<1x3xf32>
    %76 = vector.extract_strided_slice %64 {offsets = [0, 0], sizes = [1, 3], strides = [1, 1]} : vector<4x3xf32> to vector<1x3xf32>
    %77 = vector.extract_strided_slice %74 {offsets = [0, 0], sizes = [1, 1], strides = [1, 1]} : vector<1x3xf32> to vector<1x1xf32>
    %78 = vector.broadcast %77 : vector<1x1xf32> to vector<1x3xf32>
    %79 = arith.mulf %78, %65 : vector<1x3xf32>
    %80 = vector.extract_strided_slice %74 {offsets = [0, 1], sizes = [1, 1], strides = [1, 1]} : vector<1x3xf32> to vector<1x1xf32>
    %81 = vector.broadcast %80 : vector<1x1xf32> to vector<1x3xf32>
    %82 = arith.mulf %81, %66 : vector<1x3xf32>
    %83 = arith.addf %79, %82 : vector<1x3xf32>
    %84 = vector.extract_strided_slice %74 {offsets = [0, 2], sizes = [1, 1], strides = [1, 1]} : vector<1x3xf32> to vector<1x1xf32>
    %85 = vector.broadcast %84 : vector<1x1xf32> to vector<1x3xf32>
    %86 = arith.mulf %85, %67 : vector<1x3xf32>
    %87 = arith.addf %83, %86 : vector<1x3xf32>
    %88 = arith.addf %76, %87 : vector<1x3xf32>
    %89 = math.tanh %88 : vector<1x3xf32>
    %90 = vector.extract_strided_slice %89 {offsets = [0, 0], sizes = [1, 1], strides = [1, 1]} : vector<1x3xf32> to vector<1x1xf32>
    %91 = vector.broadcast %90 : vector<1x1xf32> to vector<1x3xf32>
    %92 = arith.mulf %91, %68 : vector<1x3xf32>
    %93 = vector.extract_strided_slice %89 {offsets = [0, 1], sizes = [1, 1], strides = [1, 1]} : vector<1x3xf32> to vector<1x1xf32>
    %94 = vector.broadcast %93 : vector<1x1xf32> to vector<1x3xf32>
    %95 = arith.mulf %94, %69 : vector<1x3xf32>
    %96 = arith.addf %92, %95 : vector<1x3xf32>
    %97 = vector.extract_strided_slice %89 {offsets = [0, 2], sizes = [1, 1], strides = [1, 1]} : vector<1x3xf32> to vector<1x1xf32>
    %98 = vector.broadcast %97 : vector<1x1xf32> to vector<1x3xf32>
    %99 = arith.mulf %98, %70 : vector<1x3xf32>
    %100 = arith.addf %96, %99 : vector<1x3xf32>
    %101 = vector.extract_strided_slice %75 {offsets = [0, 0], sizes = [1, 1], strides = [1, 1]} : vector<1x3xf32> to vector<1x1xf32>
    %102 = vector.broadcast %101 : vector<1x1xf32> to vector<1x3xf32>
    %103 = arith.mulf %102, %71 : vector<1x3xf32>
    %104 = vector.extract_strided_slice %75 {offsets = [0, 1], sizes = [1, 1], strides = [1, 1]} : vector<1x3xf32> to vector<1x1xf32>
    %105 = vector.broadcast %104 : vector<1x1xf32> to vector<1x3xf32>
    %106 = arith.mulf %105, %72 : vector<1x3xf32>
    %107 = arith.addf %103, %106 : vector<1x3xf32>
    %108 = vector.extract_strided_slice %75 {offsets = [0, 2], sizes = [1, 1], strides = [1, 1]} : vector<1x3xf32> to vector<1x1xf32>
    %109 = vector.broadcast %108 : vector<1x1xf32> to vector<1x3xf32>
    %110 = arith.mulf %109, %73 : vector<1x3xf32>
    %111 = arith.addf %107, %110 : vector<1x3xf32>
    %112 = arith.addf %100, %111 : vector<1x3xf32>
    %113 = arith.addf %112, %7 : vector<1x3xf32>
    %114 = math.tanh %113 : vector<1x3xf32>
    %115 = vector.extract_strided_slice %64 {offsets = [1, 0], sizes = [1, 3], strides = [1, 1]} : vector<4x3xf32> to vector<1x3xf32>
    %116 = vector.extract_strided_slice %89 {offsets = [0, 0], sizes = [1, 1], strides = [1, 1]} : vector<1x3xf32> to vector<1x1xf32>
    %117 = vector.broadcast %116 : vector<1x1xf32> to vector<1x3xf32>
    %118 = arith.mulf %117, %65 : vector<1x3xf32>
    %119 = vector.extract_strided_slice %89 {offsets = [0, 1], sizes = [1, 1], strides = [1, 1]} : vector<1x3xf32> to vector<1x1xf32>
    %120 = vector.broadcast %119 : vector<1x1xf32> to vector<1x3xf32>
    %121 = arith.mulf %120, %66 : vector<1x3xf32>
    %122 = arith.addf %118, %121 : vector<1x3xf32>
    %123 = vector.extract_strided_slice %89 {offsets = [0, 2], sizes = [1, 1], strides = [1, 1]} : vector<1x3xf32> to vector<1x1xf32>
    %124 = vector.broadcast %123 : vector<1x1xf32> to vector<1x3xf32>
    %125 = arith.mulf %124, %67 : vector<1x3xf32>
    %126 = arith.addf %122, %125 : vector<1x3xf32>
    %127 = arith.addf %115, %126 : vector<1x3xf32>
    %128 = math.tanh %127 : vector<1x3xf32>
    %129 = vector.extract_strided_slice %128 {offsets = [0, 0], sizes = [1, 1], strides = [1, 1]} : vector<1x3xf32> to vector<1x1xf32>
    %130 = vector.broadcast %129 : vector<1x1xf32> to vector<1x3xf32>
    %131 = arith.mulf %130, %68 : vector<1x3xf32>
    %132 = vector.extract_strided_slice %128 {offsets = [0, 1], sizes = [1, 1], strides = [1, 1]} : vector<1x3xf32> to vector<1x1xf32>
    %133 = vector.broadcast %132 : vector<1x1xf32> to vector<1x3xf32>
    %134 = arith.mulf %133, %69 : vector<1x3xf32>
    %135 = arith.addf %131, %134 : vector<1x3xf32>
    %136 = vector.extract_strided_slice %128 {offsets = [0, 2], sizes = [1, 1], strides = [1, 1]} : vector<1x3xf32> to vector<1x1xf32>
    %137 = vector.broadcast %136 : vector<1x1xf32> to vector<1x3xf32>
    %138 = arith.mulf %137, %70 : vector<1x3xf32>
    %139 = arith.addf %135, %138 : vector<1x3xf32>
    %140 = vector.extract_strided_slice %114 {offsets = [0, 0], sizes = [1, 1], strides = [1, 1]} : vector<1x3xf32> to vector<1x1xf32>
    %141 = vector.broadcast %140 : vector<1x1xf32> to vector<1x3xf32>
    %142 = arith.mulf %141, %71 : vector<1x3xf32>
    %143 = vector.extract_strided_slice %114 {offsets = [0, 1], sizes = [1, 1], strides = [1, 1]} : vector<1x3xf32> to vector<1x1xf32>
    %144 = vector.broadcast %143 : vector<1x1xf32> to vector<1x3xf32>
    %145 = arith.mulf %144, %72 : vector<1x3xf32>
    %146 = arith.addf %142, %145 : vector<1x3xf32>
    %147 = vector.extract_strided_slice %114 {offsets = [0, 2], sizes = [1, 1], strides = [1, 1]} : vector<1x3xf32> to vector<1x1xf32>
    %148 = vector.broadcast %147 : vector<1x1xf32> to vector<1x3xf32>
    %149 = arith.mulf %148, %73 : vector<1x3xf32>
    %150 = arith.addf %146, %149 : vector<1x3xf32>
    %151 = arith.addf %139, %150 : vector<1x3xf32>
    %152 = arith.addf %151, %7 : vector<1x3xf32>
    %153 = math.tanh %152 : vector<1x3xf32>
    %154 = vector.extract_strided_slice %64 {offsets = [2, 0], sizes = [1, 3], strides = [1, 1]} : vector<4x3xf32> to vector<1x3xf32>
    %155 = vector.extract_strided_slice %128 {offsets = [0, 0], sizes = [1, 1], strides = [1, 1]} : vector<1x3xf32> to vector<1x1xf32>
    %156 = vector.broadcast %155 : vector<1x1xf32> to vector<1x3xf32>
    %157 = arith.mulf %156, %65 : vector<1x3xf32>
    %158 = vector.extract_strided_slice %128 {offsets = [0, 1], sizes = [1, 1], strides = [1, 1]} : vector<1x3xf32> to vector<1x1xf32>
    %159 = vector.broadcast %158 : vector<1x1xf32> to vector<1x3xf32>
    %160 = arith.mulf %159, %66 : vector<1x3xf32>
    %161 = arith.addf %157, %160 : vector<1x3xf32>
    %162 = vector.extract_strided_slice %128 {offsets = [0, 2], sizes = [1, 1], strides = [1, 1]} : vector<1x3xf32> to vector<1x1xf32>
    %163 = vector.broadcast %162 : vector<1x1xf32> to vector<1x3xf32>
    %164 = arith.mulf %163, %67 : vector<1x3xf32>
    %165 = arith.addf %161, %164 : vector<1x3xf32>
    %166 = arith.addf %154, %165 : vector<1x3xf32>
    %167 = math.tanh %166 : vector<1x3xf32>
    %168 = vector.extract_strided_slice %167 {offsets = [0, 0], sizes = [1, 1], strides = [1, 1]} : vector<1x3xf32> to vector<1x1xf32>
    %169 = vector.broadcast %168 : vector<1x1xf32> to vector<1x3xf32>
    %170 = arith.mulf %169, %68 : vector<1x3xf32>
    %171 = vector.extract_strided_slice %167 {offsets = [0, 1], sizes = [1, 1], strides = [1, 1]} : vector<1x3xf32> to vector<1x1xf32>
    %172 = vector.broadcast %171 : vector<1x1xf32> to vector<1x3xf32>
    %173 = arith.mulf %172, %69 : vector<1x3xf32>
    %174 = arith.addf %170, %173 : vector<1x3xf32>
    %175 = vector.extract_strided_slice %167 {offsets = [0, 2], sizes = [1, 1], strides = [1, 1]} : vector<1x3xf32> to vector<1x1xf32>
    %176 = vector.broadcast %175 : vector<1x1xf32> to vector<1x3xf32>
    %177 = arith.mulf %176, %70 : vector<1x3xf32>
    %178 = arith.addf %174, %177 : vector<1x3xf32>
    %179 = vector.extract_strided_slice %153 {offsets = [0, 0], sizes = [1, 1], strides = [1, 1]} : vector<1x3xf32> to vector<1x1xf32>
    %180 = vector.broadcast %179 : vector<1x1xf32> to vector<1x3xf32>
    %181 = arith.mulf %180, %71 : vector<1x3xf32>
    %182 = vector.extract_strided_slice %153 {offsets = [0, 1], sizes = [1, 1], strides = [1, 1]} : vector<1x3xf32> to vector<1x1xf32>
    %183 = vector.broadcast %182 : vector<1x1xf32> to vector<1x3xf32>
    %184 = arith.mulf %183, %72 : vector<1x3xf32>
    %185 = arith.addf %181, %184 : vector<1x3xf32>
    %186 = vector.extract_strided_slice %153 {offsets = [0, 2], sizes = [1, 1], strides = [1, 1]} : vector<1x3xf32> to vector<1x1xf32>
    %187 = vector.broadcast %186 : vector<1x1xf32> to vector<1x3xf32>
    %188 = arith.mulf %187, %73 : vector<1x3xf32>
    %189 = arith.addf %185, %188 : vector<1x3xf32>
    %190 = arith.addf %178, %189 : vector<1x3xf32>
    %191 = arith.addf %190, %7 : vector<1x3xf32>
    %192 = math.tanh %191 : vector<1x3xf32>
    %193 = vector.extract_strided_slice %64 {offsets = [3, 0], sizes = [1, 3], strides = [1, 1]} : vector<4x3xf32> to vector<1x3xf32>
    %194 = vector.extract_strided_slice %167 {offsets = [0, 0], sizes = [1, 1], strides = [1, 1]} : vector<1x3xf32> to vector<1x1xf32>
    %195 = vector.broadcast %194 : vector<1x1xf32> to vector<1x3xf32>
    %196 = arith.mulf %195, %65 : vector<1x3xf32>
    %197 = vector.extract_strided_slice %167 {offsets = [0, 1], sizes = [1, 1], strides = [1, 1]} : vector<1x3xf32> to vector<1x1xf32>
    %198 = vector.broadcast %197 : vector<1x1xf32> to vector<1x3xf32>
    %199 = arith.mulf %198, %66 : vector<1x3xf32>
    %200 = arith.addf %196, %199 : vector<1x3xf32>
    %201 = vector.extract_strided_slice %167 {offsets = [0, 2], sizes = [1, 1], strides = [1, 1]} : vector<1x3xf32> to vector<1x1xf32>
    %202 = vector.broadcast %201 : vector<1x1xf32> to vector<1x3xf32>
    %203 = arith.mulf %202, %67 : vector<1x3xf32>
    %204 = arith.addf %200, %203 : vector<1x3xf32>
    %205 = arith.addf %193, %204 : vector<1x3xf32>
    %206 = math.tanh %205 : vector<1x3xf32>
    %207 = vector.extract_strided_slice %206 {offsets = [0, 0], sizes = [1, 1], strides = [1, 1]} : vector<1x3xf32> to vector<1x1xf32>
    %208 = vector.broadcast %207 : vector<1x1xf32> to vector<1x3xf32>
    %209 = arith.mulf %208, %68 : vector<1x3xf32>
    %210 = vector.extract_strided_slice %206 {offsets = [0, 1], sizes = [1, 1], strides = [1, 1]} : vector<1x3xf32> to vector<1x1xf32>
    %211 = vector.broadcast %210 : vector<1x1xf32> to vector<1x3xf32>
    %212 = arith.mulf %211, %69 : vector<1x3xf32>
    %213 = arith.addf %209, %212 : vector<1x3xf32>
    %214 = vector.extract_strided_slice %206 {offsets = [0, 2], sizes = [1, 1], strides = [1, 1]} : vector<1x3xf32> to vector<1x1xf32>
    %215 = vector.broadcast %214 : vector<1x1xf32> to vector<1x3xf32>
    %216 = arith.mulf %215, %70 : vector<1x3xf32>
    %217 = arith.addf %213, %216 : vector<1x3xf32>
    %218 = vector.extract_strided_slice %192 {offsets = [0, 0], sizes = [1, 1], strides = [1, 1]} : vector<1x3xf32> to vector<1x1xf32>
    %219 = vector.broadcast %218 : vector<1x1xf32> to vector<1x3xf32>
    %220 = arith.mulf %219, %71 : vector<1x3xf32>
    %221 = vector.extract_strided_slice %192 {offsets = [0, 1], sizes = [1, 1], strides = [1, 1]} : vector<1x3xf32> to vector<1x1xf32>
    %222 = vector.broadcast %221 : vector<1x1xf32> to vector<1x3xf32>
    %223 = arith.mulf %222, %72 : vector<1x3xf32>
    %224 = arith.addf %220, %223 : vector<1x3xf32>
    %225 = vector.extract_strided_slice %192 {offsets = [0, 2], sizes = [1, 1], strides = [1, 1]} : vector<1x3xf32> to vector<1x1xf32>
    %226 = vector.broadcast %225 : vector<1x1xf32> to vector<1x3xf32>
    %227 = arith.mulf %226, %73 : vector<1x3xf32>
    %228 = arith.addf %224, %227 : vector<1x3xf32>
    %229 = arith.addf %217, %228 : vector<1x3xf32>
    %230 = arith.addf %229, %7 : vector<1x3xf32>
    %231 = math.tanh %230 : vector<1x3xf32>
    %232 = tpu.concatenate %114, %153, %192, %231 in 0 : vector<1x3xf32>, vector<1x3xf32>, vector<1x3xf32>, vector<1x3xf32> -> vector<4x3xf32>
    %233 = arith.negf %232 : vector<4x3xf32>
    %234 = math.exp %233 : vector<4x3xf32>
    %cst_10 = arith.constant 1.000000e+00 : f32
    %235 = vector.broadcast %cst_10 : f32 to vector<4x3xf32>
    %236 = arith.addf %235, %234 : vector<4x3xf32>
    %237 = arith.divf %235, %236 : vector<4x3xf32>
    %c0_11 = arith.constant 0 : index
    %c0_12 = arith.constant 0 : index
    %238 = vector.load %arg3[%c0_11, %c0_12] : memref<4x3xf32, #tpu.memory_space<vmem>>, vector<4x3xf32>
    tpu.vector_store %arg3[%c0_11, %c0_12], %237 {strides = array<i32>} : memref<4x3xf32, #tpu.memory_space<vmem>>, vector<4x3xf32>,
    return
  }
}

</mosaic_0001>

<bundles_post_ra>
// kernel: tpu_custom_call.1
= control target key start
LH: loop header
LB: loop body
LE: loop exit
PB: predicated region body
PF: predicated region fallthrough
CT: control target
= control target key end

     0   :  { %v628_v1 = vmov 2   ;;  %v629_v2 = vmov 0   ;;  %s790_s0 = inlined_call_operand.vmem [shape: s32[4,8], index: 0, kind: input, shape index: {}]   ;;  %s791_s1 = inlined_call_operand.vmem [shape: f32[30,32], index: 1, kind: input, shape index: {}]   ;;  %s792_s2 = inlined_call_operand.vmem [shape: f32[43,3], index: 2, kind: input, shape index: {}]   ;;  %s793_s3 = inlined_call_operand.hbm [shape: f32[4,3], index: 3, kind: output, shape index: {}]  }
   0x1   :  { %v15_v0 = vld [vmem:[%s790_s0] sm:$0xf]  ;;  %560 = vset.pattern.permute.xlu1 %v628_v1  ;;  %558 = vset.pattern.permute.xlu0 %v629_v2 }
   0x2   :  { %8 = vsyncpa [#allocation3], 0  ;;  %39 = vperm.xlu1 %560, %v15_v0   ;;  %25 = vperm.xlu0 %558, %v15_v0   ;;  %v630_v3 = vmov 3   ;;  %v631_v4 = vmov 1   ;;  %v632_v5 = vmov 4   ;;  %v633_v6 = vmov 5  }
   0x3   :  { %v634_v7 = vmov 6   ;;  %v80_v8 = vld [vmem:[%s791_s1] sm:$0xff]  ;;  %v81_v9 = vld [vmem:[%s791_s1 + $0x8] sm:$0xff]  ;;  %v635_v11 = vmov 0.0|0.0   ;;  %v82_v12 = vld [vmem:[%s791_s1 + $0x10] sm:$0xff]  ;;  %v636_v14 = vmov 7   ;;  %v22_v20 = vlaneseq }
   0x4   :  { %v533_v10 = vpack.c.bf16 %v81_v9, %v80_v8  ;;  %532 = vmatprep.subr.bf16.mxu0 %v635_v11  ;;  %539 = vmatprep.subr.bf16.mxu1 %v635_v11  ;;  %v83_v13 = vld [vmem:[%s791_s1 + $0x18] sm:$0x3f]  ;;  %vm88_vm0 = vcmask 1045504   ;;  %vm637_vm1 = vmmov 1   ;;  %vm638_vm3 = vmmov 0   ;;  %v16_v17 = vld [vmem:[%s792_s2] sm:$0xff] }
   0x5   :  { %v536_v15 = vpack.c.bf16 %v83_v13, %v82_v12  ;;  %vm537_vm2 = vmpackc.low %vm88_vm0, %vm637_vm1  ;;  %v639_v16 = vmov 0.0   ;;  %v17_v18 = vld [vmem:[%s792_s2 + $0x8] sm:$0xff]  ;;  %v23_v23 = vand.u32 127, %v22_v20  ;;  %vm84_vm12 = vcmask 244736   ;;  %v18_v45 = vld [vmem:[%s792_s2 + $0x10] sm:$0xff] }
   0x6   :  { %561 = vset.pattern.permute.xlu1 %v630_v3  ;;  %559 = vset.pattern.permute.xlu0 %v631_v4  ;;  %v540_v19 = vpack.c.bf16 %v17_v18, %v16_v17  ;;  %v19_v46 = vld [vmem:[%s792_s2 + $0x18] sm:$0xff]  ;;  %vm167_vm13 = vcmask 261120   ;;  %v696_v51 = vld [vmem:[%s792_s2 + $0x20] sm:$0xff]  ;;  %v164_v53 = vshrl.u32 %v22_v20, 7  ;;  %v702_v56 = vld [vmem:[%s792_s2 + $0x28] sm:$0x7] }
   0x7   :  { %46 = vperm.xlu1 %561, %v15_v0   ;;  %32 = vperm.xlu0 %559, %v15_v0   ;;  %v543_v47 = vpack.c.bf16 %v19_v46, %v18_v45  ;;  %v241_v52 = vmul.f32 0.0, %v696_v51  ;;  %v715_v8 = vrot.slane %v696_v51, 1  ;;  %v718_v9 = vrot.slane %v696_v51, 3  ;;  %s640_s2 = smov [#allocation2]  }
   0x8   :  { %534 = vmatpush3.bf16.msra.mxu0 %v533_v10  ;;  %518 = vmatprep.mubr.msk.f32.mxu0 %vm638_vm3, %v639_v16  ;;  %v165_v55 = vsub.s32 1, %v164_v53  ;;  %v721_v12 = vrot.slane %v696_v51, 5  ;;  %vm460_vm14 = vcmask 1040384   ;;  %vm462_vm15 = vcmask 1041408   ;;  %s480_s5 = sshll.u32 %s640_s2, 4  ;;  %s481_s5 = int_to_ptr.vmem [resolvable:$true] %s480_s5 }
   0x9   :  { %535 = vmatprep.subr.bf16.mxu0 %v635_v11  ;;  %529 = vmatprep.mubr.msk.f32.mxu1 %vm638_vm3, %v639_v16  ;;  %v243_v54 = vrot.slane %v241_v52, 1  ;;  %v246_v58 = vrot.slane %v241_v52, 2  ;;  %vm464_vm0 = vcmask 1042432   ;;  %vm472_vm1 = vcmask 19456   ;;  %s604_s6 = scalar_lea.vmem %s481_s5, 64  ;;  %p609_p1 = scmp.lt.s32.totalorder %s481_s5, %s481_s5 }
   0xa   :  { %541 = vmatpush3.bf16.msra.mxu1 %v540_v19  ;;  %v166_v59 = vrot.slane %v702_v56, %v165_v55  ;;  %p605_p0 = scmp.ne.s32.totalorder %s481_s5, %s604_s6  ;;  %p610_p2 = scmp.lt.s32.totalorder %s604_s6, %s604_s6 }
   0xb   :  { %562 = vset.pattern.permute.xlu1 %v632_v5  ;;  %563 = vset.pattern.permute.xlu0 %v633_v6  ;;  %v245_v57 = vadd.f32 %v243_v54, %v241_v52  ;;  %v276_v5 = vmul.f32 0.0, %v702_v56 }
   0xc   :  { %53 = vperm.xlu1 %562, %v15_v0   ;;  %60 = vperm.xlu0 %563, %v15_v0   ;;  %p611_p3 = por %p610_p2, %p609_p1 }
   0xd   :  { %538 = vmatpush3.bf16.msk.msra.mxu0 %vm537_vm2, %v536_v15  ;;  %542 = vmatprep.subr.bf16.mxu1 %v635_v11  ;;  %v248_v60 = vadd.f32 %v246_v58, %v245_v57  ;;  %v278_v6 = vrot.slane %v276_v5, 2 }
   0xe   :  { %544 = vmatpush3.bf16.msra.mxu1 %v543_v47  ;;  %p612_p4 = pnand %p611_p3, %p605_p0 }
   0xf   :  { %v280_v13 = vadd.f32 %v278_v6, %v245_v57 }
  0x10   :  { %564 = vset.pattern.permute.xlu1 %v634_v7  ;;  %566 = vset.pattern.permute.xlu0 %v629_v2  ;;  %v712_v7 = vrot.slane %v696_v51, 4 }
  0x11   :  { %67 = vperm.xlu1 %564, %v15_v0   ;;  %v282_v19 = vrot.slane %v280_v13, 6 }
  0x15   :  { %565 = vset.pattern.permute.xlu1 %v636_v14  ;;  %v724_v14 = vrot.slane %v696_v51, 2 }
  0x16   :  { %74 = vperm.xlu1 %565, %v15_v0  }
  0x1a   :  { %567 = vset.pattern.permute.xlu1 %v631_v4 }
  0x81   :  { %v40_v21 = vpop.permute.xlu1 %39  ;;  %v26_v22 = vpop.permute.xlu0 %25 }
  0x82   :  { %vm27_vm4 = vcmp.eq.s32.totalorder %v26_v22, %v23_v23  ;;  %vm41_vm5 = vcmp.eq.s32.totalorder %v40_v21, %v23_v23 }
  0x83   :  { %v488_v26 = vsel %vm27_vm4, 1.0, %v639_v16  ;;  %v490_v29 = vsel %vm41_vm5, 1.0, %v639_v16 }
  0x86   :  { %v47_v24 = vpop.permute.xlu1 %46  ;;  %v33_v25 = vpop.permute.xlu0 %32 }
  0x87   :  { %vm34_vm6 = vcmp.eq.s32.totalorder %v33_v25, %v23_v23  ;;  %vm48_vm7 = vcmp.eq.s32.totalorder %v47_v24, %v23_v23  ;;  %v286_v25 = vrot.slane %v702_v56, 2 }
  0x88   :  { %v489_v27 = vsel %vm34_vm6, 1.0, %v639_v16  ;;  %v491_v33 = vsel %vm48_vm7, 1.0, %v639_v16 }
  0x89   :  { %v37_v28 = vadd.f32 %v489_v27, %v488_v26 }
  0x8b   :  { %v44_v30 = vadd.f32 %v490_v29, %v37_v28  ;;  %v54_v31 = vpop.permute.xlu1 %53  ;;  %v61_v32 = vpop.permute.xlu0 %60 }
  0x8c   :  { %vm55_vm8 = vcmp.eq.s32.totalorder %v54_v31, %v23_v23  ;;  %vm62_vm9 = vcmp.eq.s32.totalorder %v61_v32, %v23_v23 }
  0x8d   :  { %v51_v34 = vadd.f32 %v491_v33, %v44_v30  ;;  %v492_v35 = vsel %vm55_vm8, 1.0, %v639_v16  ;;  %v493_v37 = vsel %vm62_vm9, 1.0, %v639_v16 }
  0x8f   :  { %v58_v36 = vadd.f32 %v492_v35, %v51_v34 }
  0x90   :  { %v68_v38 = vpop.permute.xlu1 %67 }
  0x91   :  { %vm69_vm10 = vcmp.eq.s32.totalorder %v68_v38, %v23_v23  ;;  %v65_v39 = vadd.f32 %v493_v37, %v58_v36  ;;  %v334_v36 = vrot.slane %v696_v51, 7  ;;  %v327_v37 = vrot.slane %v696_v51, 6 }
  0x92   :  { %v494_v40 = vsel %vm69_vm10, 1.0, %v639_v16 }
  0x93   :  { %v72_v42 = vadd.f32 %v494_v40, %v65_v39 }
  0x95   :  { %v75_v41 = vpop.permute.xlu1 %74 }
  0x96   :  { %vm76_vm11 = vcmp.eq.s32.totalorder %v75_v41, %v23_v23 }
  0x97   :  { %v495_v43 = vsel %vm76_vm11, 1.0, %v639_v16 }
  0x98   :  { %v79_v44 = vadd.f32 %v495_v43, %v72_v42 }
  0x9a   :  { %519 = vmatmul.mubr.msk.f32.vlgmr.msra.gmra.mrb[0].mxu0 %vm84_vm12, %v79_v44 }
 0x16d   :  { %v158_v48 = vpop.f32.mrb[0].mxu0 }
 0x16e   :  { %v162_v49 = vmul.f32 0.125, %v158_v48  ;;  %v520_v50 = vpop.f32.mrb[1].mxu0 }
 0x170   :  { %530 = vmatmul.mubr.msk.f32.vlgmr.msra.gmra.mrb[0].mxu1 %vm167_vm13, %v162_v49 }
 0x243   :  { %v237_v61 = vpop.f32.mrb[0].mxu1 }
 0x244   :  { %v705_v62 = vadd.f32 %v237_v61, %v166_v59  ;;  %v531_v63 = vpop.f32.mrb[1].mxu1 }
 0x246   :  { %v249_v0 = vadd.f32 %v248_v60, %v705_v62  ;;  %v348_v60 = vrot.slane %v702_v56, 1 }
 0x248   :  { %584 = vtanh.f32 %v249_v0 }
 0x252   :  { %v585_v3 = vpop.eup %584 }
 0x253   :  { %261 = vperm.xlu1 %567, %v585_v3   ;;  %253 = vperm.xlu0 %566, %v585_v3  }
 0x257   :  { %568 = vset.pattern.permute.xlu1 %v628_v1 }
 0x258   :  { %269 = vperm.xlu1 %568, %v585_v3  }
 0x25c   :  { %569 = vset.pattern.permute.xlu1 %v631_v4 }
 0x2d2   :  { %v262_v10 = vpop.permute.xlu1 %261  ;;  %v254_v11 = vpop.permute.xlu0 %253 }
 0x2d3   :  { %v266_v15 = vmul.f32 %v712_v7, %v262_v10  ;;  %v293_v16 = vmul.f32 %v715_v8, %v262_v10  ;;  %v259_v17 = vmul.f32 %v718_v9, %v254_v11  ;;  %v290_v18 = vmul.f32 %v254_v11, %v696_v51 }
 0x2d5   :  { %v267_v21 = vadd.f32 %v266_v15, %v259_v17  ;;  %v294_v22 = vadd.f32 %v293_v16, %v290_v18  ;;  %v396_v15 = vrot.slane %v702_v56, 7 }
 0x2d7   :  { %v270_v20 = vpop.permute.xlu1 %269 }
 0x2d8   :  { %v274_v23 = vmul.f32 %v721_v12, %v270_v20  ;;  %v297_v24 = vmul.f32 %v724_v14, %v270_v20 }
 0x2da   :  { %v275_v26 = vadd.f32 %v274_v23, %v267_v21  ;;  %v298_v27 = vadd.f32 %v297_v24, %v294_v22 }
 0x2dc   :  { %v284_v28 = vadd.f32 %v282_v19, %v275_v26  ;;  %v300_v29 = vrot.slane %v298_v27, 7 }
 0x2de   :  { %v288_v30 = vadd.f32 %v286_v25, %v284_v28  ;;  %v302_v31 = vadd.f32 %v300_v29, %v705_v62 }
 0x2e0   :  { %586 = vtanh.f32 %v288_v30 }
 0x2e1   :  { %588 = vtanh.f32 %v302_v31 }
 0x2ea   :  { %v734_v32 = vpop.eup %586 }
 0x2eb   :  { %331 = vperm.xlu1 %569, %v734_v32   ;;  %324 = vperm.xlu0 %566, %v734_v32   ;;  %v589_v33 = vpop.eup %588 }
 0x2ef   :  { %311 = vperm.xlu1 %569, %v589_v33   ;;  %306 = vperm.xlu0 %566, %v589_v33  }
 0x2f3   :  { %571 = vset.pattern.permute.xlu1 %v628_v1  ;;  %570 = vset.pattern.permute.xlu0 %v628_v1 }
 0x2f4   :  { %317 = vperm.xlu1 %571, %v589_v33   ;;  %339 = vperm.xlu0 %570, %v734_v32  }
 0x2f8   :  { %572 = vset.pattern.permute.xlu1 %v629_v2  ;;  %575 = vset.pattern.permute.xlu0 %v631_v4 }
 0x36a   :  { %v332_v34 = vpop.permute.xlu1 %331  ;;  %v325_v35 = vpop.permute.xlu0 %324 }
 0x36b   :  { %v336_v40 = vmul.f32 %v334_v36, %v332_v34  ;;  %v329_v41 = vmul.f32 %v327_v37, %v325_v35 }
 0x36d   :  { %v337_v46 = vadd.f32 %v336_v40, %v329_v41 }
 0x36e   :  { %v312_v38 = vpop.permute.xlu1 %311  ;;  %v307_v39 = vpop.permute.xlu0 %306 }
 0x36f   :  { %v353_v42 = vmul.f32 %v312_v38, %v696_v51  ;;  %v352_v43 = vmul.f32 %v334_v36, %v307_v39  ;;  %v314_v44 = vmul.f32 %v312_v38, %v718_v9  ;;  %v309_v45 = vmul.f32 %v307_v39, %v724_v14 }
 0x371   :  { %v354_v49 = vadd.f32 %v353_v42, %v352_v43  ;;  %v315_v54 = vadd.f32 %v314_v44, %v309_v45 }
 0x373   :  { %v318_v47 = vpop.permute.xlu1 %317  ;;  %v340_v48 = vpop.permute.xlu0 %339 }
 0x374   :  { %v320_v50 = vmul.f32 %v318_v47, %v712_v7  ;;  %v355_v52 = vmul.f32 %v318_v47, %v715_v8  ;;  %v342_v53 = vmul.f32 %v340_v48, %v702_v56 }
 0x376   :  { %v356_v55 = vadd.f32 %v355_v52, %v354_v49  ;;  %v343_v57 = vadd.f32 %v342_v53, %v337_v46  ;;  %v321_v58 = vadd.f32 %v320_v50, %v315_v54 }
 0x378   :  { %v358_v59 = vrot.slane %v356_v55, 7  ;;  %v345_v61 = vrot.slane %v343_v57, 7 }
 0x37a   :  { %v360_v63 = vadd.f32 %v358_v59, %v705_v62  ;;  %v347_v0 = vadd.f32 %v345_v61, %v321_v58 }
 0x37c   :  { %590 = vtanh.f32 %v360_v63  ;;  %v350_v3 = vadd.f32 %v348_v60, %v347_v0 }
 0x37e   :  { %592 = vtanh.f32 %v350_v3 }
 0x386   :  { %v591_v5 = vpop.eup %590 }
 0x387   :  { %364 = vperm.xlu1 %572, %v591_v5  }
 0x388   :  { %v593_v6 = vpop.eup %592 }
 0x389   :  { %387 = vperm.xlu0 %575, %v593_v6   ;;  %v461_v41 = vsel %vm460_vm14, %v734_v32, %v593_v6  ;;  %v450_v32 = vrot.slane %v702_v56, 6 }
 0x38b   :  { %573 = vset.pattern.permute.xlu1 %v631_v4 }
 0x38c   :  { %369 = vperm.xlu1 %573, %v591_v5  }
 0x38d   :  { %576 = vset.pattern.permute.xlu0 %v628_v1 }
 0x38e   :  { %393 = vperm.xlu0 %576, %v593_v6  }
 0x390   :  { %574 = vset.pattern.permute.xlu1 %v629_v2 }
 0x391   :  { %382 = vperm.xlu1 %574, %v593_v6  }
 0x392   :  { %581 = vset.pattern.permute.xlu0 %v631_v4 }
 0x395   :  { %577 = vset.pattern.permute.xlu1 %v628_v1 }
 0x396   :  { %375 = vperm.xlu1 %577, %v591_v5  }
 0x39a   :  { %578 = vset.pattern.permute.xlu1 %v629_v2 }
 0x406   :  { %v365_v10 = vpop.permute.xlu1 %364 }
 0x407   :  { %v367_v24 = vmul.f32 %v365_v10, %v715_v8  ;;  %v406_v25 = vmul.f32 %v365_v10, %v327_v37 }
 0x408   :  { %v388_v11 = vpop.permute.xlu0 %387 }
 0x409   :  { %v390_v18 = vmul.f32 %v388_v11, %v327_v37 }
 0x40b   :  { %v370_v13 = vpop.permute.xlu1 %369 }
 0x40c   :  { %v372_v20 = vmul.f32 %v370_v13, %v724_v14  ;;  %v407_v21 = vmul.f32 %v370_v13, %v334_v36 }
 0x40d   :  { %v394_v16 = vpop.permute.xlu0 %393 }
 0x40e   :  { %v398_v22 = vmul.f32 %v396_v15, %v394_v16  ;;  %v373_v28 = vadd.f32 %v372_v20, %v367_v24  ;;  %v408_v29 = vadd.f32 %v407_v21, %v406_v25 }
 0x410   :  { %v383_v17 = vpop.permute.xlu1 %382 }
 0x411   :  { %v385_v19 = vmul.f32 %v383_v17, %v721_v12 }
 0x413   :  { %v391_v23 = vadd.f32 %v390_v18, %v385_v19 }
 0x415   :  { %v399_v26 = vadd.f32 %v398_v22, %v391_v23  ;;  %v376_v27 = vpop.permute.xlu1 %375 }
 0x416   :  { %v378_v30 = vmul.f32 %v376_v27, %v718_v9  ;;  %v409_v31 = vmul.f32 %v376_v27, %v696_v51 }
 0x417   :  { %v401_v33 = vrot.slane %v399_v26, 7 }
 0x418   :  { %v379_v34 = vadd.f32 %v378_v30, %v373_v28  ;;  %v410_v35 = vadd.f32 %v409_v31, %v408_v29 }
 0x41a   :  { %v403_v38 = vadd.f32 %v401_v33, %v379_v34  ;;  %v412_v39 = vrot.slane %v410_v35, 7 }
 0x41c   :  { %v404_v36 = vadd.f32 %v403_v38, %v702_v56  ;;  %v414_v40 = vadd.f32 %v412_v39, %v705_v62 }
 0x41e   :  { %594 = vtanh.f32 %v404_v36 }
 0x41f   :  { %596 = vtanh.f32 %v414_v40 }
 0x428   :  { %v595_v37 = vpop.eup %594 }
 0x429   :  { %v597_v42 = vpop.eup %596  ;;  %441 = vperm.xlu0 %581, %v595_v37   ;;  %v463_v9 = vsel %vm462_vm15, %v461_v41, %v595_v37 }
 0x42a   :  { %418 = vperm.xlu1 %578, %v597_v42  }
 0x42d   :  { %582 = vset.pattern.permute.xlu0 %v628_v1 }
 0x42e   :  { %579 = vset.pattern.permute.xlu1 %v631_v4  ;;  %447 = vperm.xlu0 %582, %v595_v37  }
 0x42f   :  { %423 = vperm.xlu1 %579, %v597_v42  }
 0x433   :  { %580 = vset.pattern.permute.xlu1 %v629_v2 }
 0x434   :  { %436 = vperm.xlu1 %580, %v595_v37  }
 0x438   :  { %583 = vset.pattern.permute.xlu1 %v628_v1 }
 0x439   :  { %429 = vperm.xlu1 %583, %v597_v42  }
 0x4a8   :  { %v442_v43 = vpop.permute.xlu0 %441 }
 0x4a9   :  { %v419_v62 = vpop.permute.xlu1 %418  ;;  %v444_v47 = vmul.f32 %v442_v43, %v721_v12 }
 0x4aa   :  { %v421_v2 = vmul.f32 %v419_v62, %v696_v51 }
 0x4ad   :  { %v448_v45 = vpop.permute.xlu0 %447 }
 0x4ae   :  { %v424_v44 = vpop.permute.xlu1 %423  ;;  %v452_v49 = vmul.f32 %v450_v32, %v448_v45 }
 0x4af   :  { %v426_v4 = vmul.f32 %v424_v44, %v715_v8 }
 0x4b1   :  { %v427_v53 = vadd.f32 %v426_v4, %v421_v2 }
 0x4b3   :  { %v437_v46 = vpop.permute.xlu1 %436 }
 0x4b4   :  { %v439_v48 = vmul.f32 %v437_v46, %v712_v7 }
 0x4b6   :  { %v445_v50 = vadd.f32 %v444_v47, %v439_v48 }
 0x4b8   :  { %v453_v52 = vadd.f32 %v452_v49, %v445_v50  ;;  %v430_v1 = vpop.permute.xlu1 %429 }
 0x4b9   :  { %v432_v54 = vmul.f32 %v430_v1, %v724_v14 }
 0x4ba   :  { %v455_v55 = vrot.slane %v453_v52, 7 }
 0x4bb   :  { %v433_v57 = vadd.f32 %v432_v54, %v427_v53 }
 0x4bd   :  { %v457_v56 = vadd.f32 %v455_v55, %v433_v57 }
 0x4bf   :  { %v458_v58 = vadd.f32 %v457_v56, %v396_v15 }
 0x4c1   :  { %598 = vtanh.f32 %v458_v58 }
 0x4cb   :  { %v599_v12 = vpop.eup %598 }
 0x4cc   :  { %v465_v59 = vsel %vm464_vm0, %v463_v9, %v599_v12 }
 0x4cd   :  { %v499_v7 = vmul.f32 -1.442695, %v465_v59 }
 0x4cf   :  { %600 = vpow2.f32 %v499_v7 }
 0x4d9   :  { %v601_v8 = vpop.eup %600 }
 0x4da   :  { %v469_v60 = vadd.f32 1.0, %v601_v8 }
 0x4dc   :  { %602 = vrcp.f32 %v469_v60 }
 0x4e6   :  { %v603_v51 = vpop.eup %602 }
 0x4e7   :  { %473 = vst.msk [vmem:[#allocation2] sm:$0xf] %vm472_vm1, %v603_v51 }
 0x4e8   :  { %615 = shalt.err (!%p612_p4)
}
 0x4e9   :  { %s616_s9 = scalar_lea.hbm %s793_s3, 64 }
 0x4ea   :  { %p617_p5 = scmp.ne.s32.totalorder %s793_s3, %s616_s9  ;;  %p620_p6 = scmp.lt.u32.totalorder %s616_s9, %s793_s3 }
 0x4ec   :  { %p622_p7 = pnand %p620_p6, %p617_p5 }
 0x4ee   :  { %625 = shalt.err (!%p622_p7)
}
 0x4ef   :  { %483 = dma.vmem_to_hbm [thread:$0]  %s481_s5, 64, %s793_s3, [#allocation3]  }
 0x4f0   :  { %626 = dma.done.wait [#allocation3], 64  }
 0x4f1   :  { %627 = vsyncadd [#allocation3], 4294967232 }
 0x4f2   :  { %487 = vsyncpa [#allocation3], 1 }

</bundles_post_ra>
